<compile_context>
chip_gen: v7x
topology: tpu7x:2x2x1
jax: 0.10.0
libtpu: 0.0.40
codegen_flags: <defaults>
</compile_context>

<pallas_src>
import jax
import jax.numpy as jnp
from jax import lax
from jax.experimental import pallas as pl
from jax.experimental.pallas import tpu as pltpu


def _fjoint_kernel(p_ref, rpy_ref, t_off_ref, t_joint_ref):
    # ---- T_offset: pr2t(p_offset, rpy2r(rpy_offset)), computed once ----------
    @pl.when(pl.program_id(0) == 0)
    def _():
        ang = rpy_ref[...]                      # (1, 3): [roll, pitch, yaw]
        c = jnp.cos(ang)                        # vector EUP ops
        s = jnp.sin(ang)
        cr, sr = c[:, 0:1], s[:, 0:1]           # (1, 1) slices
        cp, sp = c[:, 1:2], s[:, 1:2]
        cy, sy = c[:, 2:3], s[:, 2:3]

        row = lax.broadcasted_iota(jnp.int32, (4, 4), 0)
        col = lax.broadcasted_iota(jnp.int32, (4, 4), 1)

        def oh(i, j):                           # one-hot (4,4) mask, iota-based
            return ((row == i) & (col == j)).astype(jnp.float32)

        rot = (
            oh(0, 0) * (cy * cp)
            + oh(0, 1) * (cy * sp * sr - sy * cr)
            + oh(0, 2) * (cy * sp * cr + sy * sr)
            + oh(1, 0) * (sy * cp)
            + oh(1, 1) * (sy * sp * sr + cy * cr)
            + oh(1, 2) * (sy * sp * cr - cy * sr)
            + oh(2, 0) * (-sp)
            + oh(2, 1) * (cp * sr)
            + oh(2, 2) * (cp * cr)
        )
        # Translation column: p goes into column 3, rows 0..2.
        col3_mask = ((col == 3) & (row < 3)).astype(jnp.float32)
        trans = p_ref[...] * col3_mask          # (4,1) * (4,4) -> (4,4)
        t_off_ref[...] = rot + trans + oh(3, 3)

    # ---- T_joint: lane-dense batched identity slab ---------------------------
    # Each 128-lane row holds 8 flattened 4x4 identity matrices: within a
    # 16-lane group the diagonal sits at offsets {0, 5, 10, 15}.
    lane = lax.broadcasted_iota(jnp.int32, (1, 128), 1)
    g = lane & 15
    pattern = ((g == 0) | (g == 5) | (g == 10) | (g == 15)).astype(jnp.float32)
    t_joint_ref[...] = jnp.broadcast_to(pattern, t_joint_ref.shape)


def fjoint_forward(joint_value, p_offset, rpy_offset):
    """Pallas implementation of Fjoint.forward.

    joint_value: (B, A) float32 (only the batch dim is used, as in PyTorch)
    p_offset:    (3, 1) float32 parameter
    rpy_offset:  (3,)   float32 parameter
    returns: (T_offset (4,4) f32, T_joint (B,4,4) f32)
    """
    batch_size = joint_value.shape[0]
    p4 = jnp.concatenate(
        [p_offset.reshape(3).astype(jnp.float32), jnp.zeros((1,), jnp.float32)]
    ).reshape(4, 1)
    rpy = rpy_offset.reshape(1, 3).astype(jnp.float32)

    # Lane-dense slab: 8 identity matrices (8 * 16 = 128 floats) per row.
    num_rows = pl.cdiv(batch_size, 8)
    if num_rows <= 512:
        block_rows = num_rows          # single block == full array (no (8,128) issue)
        padded_rows = num_rows
    else:
        block_rows = 512               # 512 x 128 f32 = 256 KiB per output block
        padded_rows = pl.cdiv(num_rows, block_rows) * block_rows
    grid = (padded_rows // block_rows,)

    out_shapes = (
        jax.ShapeDtypeStruct((4, 4), jnp.float32),
        jax.ShapeDtypeStruct((padded_rows, 128), jnp.float32),
    )
    t_offset, slab = pl.pallas_call(
        _fjoint_kernel,
        out_shape=out_shapes,
        grid=grid,
        in_specs=[
            pl.BlockSpec((4, 1), lambda i: (0, 0)),   # p_offset (padded to 4)
            pl.BlockSpec((1, 3), lambda i: (0, 0)),   # rpy_offset
        ],
        out_specs=(
            pl.BlockSpec((4, 4), lambda i: (0, 0)),               # T_offset
            pl.BlockSpec((block_rows, 128), lambda i: (i, 0)),    # T_joint slab
        ),
        compiler_params=pltpu.CompilerParams(
            dimension_semantics=("arbitrary",)),
    )(p4, rpy)

    # Layout plumbing back to the PyTorch (B, 4, 4) convention (outside the kernel).
    t_joint = slab.reshape(-1)[: batch_size * 16].reshape(batch_size, 4, 4)
    return t_offset, t_joint


def fjoint_get_q_value(act_embed):
    # ZeroOutLayer(act_embed).squeeze(1) -> zeros of shape (B,). Trivial glue,
    # not part of forward(); no kernel needed.
    return jnp.zeros((act_embed.shape[0],), jnp.float32)


def _reference_forward(joint_value, p_offset, rpy_offset):
    r, p, y = rpy_offset[0], rpy_offset[1], rpy_offset[2]
    cr, sr = jnp.cos(r), jnp.sin(r)
    cp, sp = jnp.cos(p), jnp.sin(p)
    cy, sy = jnp.cos(y), jnp.sin(y)
    R = jnp.array(
        [[cy * cp, cy * sp * sr - sy * cr, cy * sp * cr + sy * sr],
         [sy * cp, sy * sp * sr + cy * cr, sy * sp * cr - cy * sr],
         [-sp, cp * sr, cp * cr]], jnp.float32)
    T = jnp.zeros((4, 4), jnp.float32)
    T = T.at[:3, :3].set(R)
    T = T.at[:3, 3].set(p_offset.reshape(3))
    T = T.at[3, 3].set(1.0)
    T_joint = jnp.tile(jnp.eye(4, dtype=jnp.float32), (joint_value.shape[0], 1, 1))
    return T, T_joint


if __name__ == "__main__":
    key = jax.random.PRNGKey(0)
    k1, k2, k3 = jax.random.split(key, 3)

    batch_size = 2
    actuator_dim = 4
    p_offset_std = 0.1
    rpy_offset_std = 0.1

    # Deterministic parameter init (mirrors init.normal_ in __init__).
    p_offset = p_offset_std * jax.random.normal(k1, (3, 1), jnp.float32)
    rpy_offset = rpy_offset_std * jax.random.normal(k2, (3,), jnp.float32)

    joint_value = jax.random.normal(k3, (batch_size, actuator_dim), jnp.float32)

    T_offset, T_joint = fjoint_forward(joint_value, p_offset, rpy_offset)
    jax.block_until_ready((T_offset, T_joint))

    # Correctness check against a pure-JAX reference.
    T_offset_ref, T_joint_ref = _reference_forward(joint_value, p_offset, rpy_offset)
    assert T_offset.shape == (4, 4) and T_joint.shape == (batch_size, 4, 4)
    assert jnp.allclose(T_offset, T_offset_ref, atol=1e-6)
    assert jnp.allclose(T_joint, T_joint_ref, atol=1e-6)

    # Also exercise the padded / multi-identity-per-row path (B not multiple of 8).
    jv20 = jax.random.normal(k3, (20, actuator_dim), jnp.float32)
    T_off20, T_joint20 = fjoint_forward(jv20, p_offset, rpy_offset)
    jax.block_until_ready((T_off20, T_joint20))
    T_off20_ref, T_joint20_ref = _reference_forward(jv20, p_offset, rpy_offset)
    assert T_joint20.shape == (20, 4, 4)
    assert jnp.allclose(T_off20, T_off20_ref, atol=1e-6)
    assert jnp.allclose(T_joint20, T_joint20_ref, atol=1e-6)

    print("KERNEL_OK")
</pallas_src>

<mosaic_0001>
module attributes {stable_mosaic.version = 11 : i64} {
  func.func @_fjoint_kernel(%arg0: i32, %arg1: memref<4x1xf32, #tpu.memory_space<vmem>>, %arg2: memref<1x3xf32, #tpu.memory_space<vmem>>, %arg3: memref<4x4xf32, #tpu.memory_space<vmem>>, %arg4: memref<1x128xf32, #tpu.memory_space<vmem>>) attributes {dimension_semantics = [#tpu.dimension_semantics<arbitrary>], iteration_bounds = array<i64: 1>, scalar_prefetch = 0 : i64, scratch_operands = 0 : i64, tpu.core_type = #tpu.core_type<tc>, window_params = [{pipeline_mode = #tpu.pipeline_mode<synchronous>, transform_indices = @transform_0, window_bounds = array<i64: 4, 1>}, {pipeline_mode = #tpu.pipeline_mode<synchronous>, transform_indices = @transform_1, window_bounds = array<i64: 1, 3>}, {pipeline_mode = #tpu.pipeline_mode<synchronous>, transform_indices = @transform_2, window_bounds = array<i64: 4, 4>}, {transform_indices = @transform_3, window_bounds = array<i64: 1, 128>}]} {
    %c0_i32 = arith.constant 0 : i32
    %0 = arith.cmpi eq, %arg0, %c0_i32 : i32
    %1 = arith.extui %0 : i1 to i32
    %c0_i32_0 = arith.constant 0 : i32
    %2 = arith.cmpi ne, %1, %c0_i32_0 : i32
    scf.if %2 {
      %c0_4 = arith.constant 0 : index
      %c0_5 = arith.constant 0 : index
      %20 = vector.load %arg2[%c0_4, %c0_5] : memref<1x3xf32, #tpu.memory_space<vmem>>, vector<1x3xf32>
      %21 = math.cos %20 : vector<1x3xf32>
      %22 = math.sin %20 : vector<1x3xf32>
      %23 = vector.extract_strided_slice %21 {offsets = [0, 0], sizes = [1, 1], strides = [1, 1]} : vector<1x3xf32> to vector<1x1xf32>
      %24 = vector.extract_strided_slice %22 {offsets = [0, 0], sizes = [1, 1], strides = [1, 1]} : vector<1x3xf32> to vector<1x1xf32>
      %25 = vector.extract_strided_slice %21 {offsets = [0, 1], sizes = [1, 1], strides = [1, 1]} : vector<1x3xf32> to vector<1x1xf32>
      %26 = vector.extract_strided_slice %22 {offsets = [0, 1], sizes = [1, 1], strides = [1, 1]} : vector<1x3xf32> to vector<1x1xf32>
      %27 = vector.extract_strided_slice %21 {offsets = [0, 2], sizes = [1, 1], strides = [1, 1]} : vector<1x3xf32> to vector<1x1xf32>
      %28 = vector.extract_strided_slice %22 {offsets = [0, 2], sizes = [1, 1], strides = [1, 1]} : vector<1x3xf32> to vector<1x1xf32>
      %29 = tpu.iota {dimensions = array<i32: 0>} : vector<4x4xi32>
      %30 = tpu.iota {dimensions = array<i32: 1>} : vector<4x4xi32>
      %c0_i32_6 = arith.constant 0 : i32
      %31 = vector.broadcast %c0_i32_6 : i32 to vector<4x4xi32>
      %32 = arith.cmpi eq, %29, %31 : vector<4x4xi32>
      %c0_i32_7 = arith.constant 0 : i32
      %33 = vector.broadcast %c0_i32_7 : i32 to vector<4x4xi32>
      %34 = arith.cmpi eq, %30, %33 : vector<4x4xi32>
      %35 = arith.andi %32, %34 : vector<4x4xi1>
      %36 = arith.extui %35 : vector<4x4xi1> to vector<4x4xi32>
      %37 = arith.sitofp %36 : vector<4x4xi32> to vector<4x4xf32>
      %38 = arith.mulf %27, %25 : vector<1x1xf32>
      %39 = vector.broadcast %38 : vector<1x1xf32> to vector<4x4xf32>
      %40 = arith.mulf %37, %39 : vector<4x4xf32>
      %c0_i32_8 = arith.constant 0 : i32
      %41 = vector.broadcast %c0_i32_8 : i32 to vector<4x4xi32>
      %42 = arith.cmpi eq, %29, %41 : vector<4x4xi32>
      %c1_i32 = arith.constant 1 : i32
      %43 = vector.broadcast %c1_i32 : i32 to vector<4x4xi32>
      %44 = arith.cmpi eq, %30, %43 : vector<4x4xi32>
      %45 = arith.andi %42, %44 : vector<4x4xi1>
      %46 = arith.extui %45 : vector<4x4xi1> to vector<4x4xi32>
      %47 = arith.sitofp %46 : vector<4x4xi32> to vector<4x4xf32>
      %48 = arith.mulf %27, %26 : vector<1x1xf32>
      %49 = arith.mulf %48, %24 : vector<1x1xf32>
      %50 = arith.mulf %28, %23 : vector<1x1xf32>
      %51 = arith.subf %49, %50 : vector<1x1xf32>
      %52 = vector.broadcast %51 : vector<1x1xf32> to vector<4x4xf32>
      %53 = arith.mulf %47, %52 : vector<4x4xf32>
      %54 = arith.addf %40, %53 : vector<4x4xf32>
      %c0_i32_9 = arith.constant 0 : i32
      %55 = vector.broadcast %c0_i32_9 : i32 to vector<4x4xi32>
      %56 = arith.cmpi eq, %29, %55 : vector<4x4xi32>
      %c2_i32 = arith.constant 2 : i32
      %57 = vector.broadcast %c2_i32 : i32 to vector<4x4xi32>
      %58 = arith.cmpi eq, %30, %57 : vector<4x4xi32>
      %59 = arith.andi %56, %58 : vector<4x4xi1>
      %60 = arith.extui %59 : vector<4x4xi1> to vector<4x4xi32>
      %61 = arith.sitofp %60 : vector<4x4xi32> to vector<4x4xf32>
      %62 = arith.mulf %27, %26 : vector<1x1xf32>
      %63 = arith.mulf %62, %23 : vector<1x1xf32>
      %64 = arith.mulf %28, %24 : vector<1x1xf32>
      %65 = arith.addf %63, %64 : vector<1x1xf32>
      %66 = vector.broadcast %65 : vector<1x1xf32> to vector<4x4xf32>
      %67 = arith.mulf %61, %66 : vector<4x4xf32>
      %68 = arith.addf %54, %67 : vector<4x4xf32>
      %c1_i32_10 = arith.constant 1 : i32
      %69 = vector.broadcast %c1_i32_10 : i32 to vector<4x4xi32>
      %70 = arith.cmpi eq, %29, %69 : vector<4x4xi32>
      %c0_i32_11 = arith.constant 0 : i32
      %71 = vector.broadcast %c0_i32_11 : i32 to vector<4x4xi32>
      %72 = arith.cmpi eq, %30, %71 : vector<4x4xi32>
      %73 = arith.andi %70, %72 : vector<4x4xi1>
      %74 = arith.extui %73 : vector<4x4xi1> to vector<4x4xi32>
      %75 = arith.sitofp %74 : vector<4x4xi32> to vector<4x4xf32>
      %76 = arith.mulf %28, %25 : vector<1x1xf32>
      %77 = vector.broadcast %76 : vector<1x1xf32> to vector<4x4xf32>
      %78 = arith.mulf %75, %77 : vector<4x4xf32>
      %79 = arith.addf %68, %78 : vector<4x4xf32>
      %c1_i32_12 = arith.constant 1 : i32
      %80 = vector.broadcast %c1_i32_12 : i32 to vector<4x4xi32>
      %81 = arith.cmpi eq, %29, %80 : vector<4x4xi32>
      %c1_i32_13 = arith.constant 1 : i32
      %82 = vector.broadcast %c1_i32_13 : i32 to vector<4x4xi32>
      %83 = arith.cmpi eq, %30, %82 : vector<4x4xi32>
      %84 = arith.andi %81, %83 : vector<4x4xi1>
      %85 = arith.extui %84 : vector<4x4xi1> to vector<4x4xi32>
      %86 = arith.sitofp %85 : vector<4x4xi32> to vector<4x4xf32>
      %87 = arith.mulf %28, %26 : vector<1x1xf32>
      %88 = arith.mulf %87, %24 : vector<1x1xf32>
      %89 = arith.mulf %27, %23 : vector<1x1xf32>
      %90 = arith.addf %88, %89 : vector<1x1xf32>
      %91 = vector.broadcast %90 : vector<1x1xf32> to vector<4x4xf32>
      %92 = arith.mulf %86, %91 : vector<4x4xf32>
      %93 = arith.addf %79, %92 : vector<4x4xf32>
      %c1_i32_14 = arith.constant 1 : i32
      %94 = vector.broadcast %c1_i32_14 : i32 to vector<4x4xi32>
      %95 = arith.cmpi eq, %29, %94 : vector<4x4xi32>
      %c2_i32_15 = arith.constant 2 : i32
      %96 = vector.broadcast %c2_i32_15 : i32 to vector<4x4xi32>
      %97 = arith.cmpi eq, %30, %96 : vector<4x4xi32>
      %98 = arith.andi %95, %97 : vector<4x4xi1>
      %99 = arith.extui %98 : vector<4x4xi1> to vector<4x4xi32>
      %100 = arith.sitofp %99 : vector<4x4xi32> to vector<4x4xf32>
      %101 = arith.mulf %28, %26 : vector<1x1xf32>
      %102 = arith.mulf %101, %23 : vector<1x1xf32>
      %103 = arith.mulf %27, %24 : vector<1x1xf32>
      %104 = arith.subf %102, %103 : vector<1x1xf32>
      %105 = vector.broadcast %104 : vector<1x1xf32> to vector<4x4xf32>
      %106 = arith.mulf %100, %105 : vector<4x4xf32>
      %107 = arith.addf %93, %106 : vector<4x4xf32>
      %c2_i32_16 = arith.constant 2 : i32
      %108 = vector.broadcast %c2_i32_16 : i32 to vector<4x4xi32>
      %109 = arith.cmpi eq, %29, %108 : vector<4x4xi32>
      %c0_i32_17 = arith.constant 0 : i32
      %110 = vector.broadcast %c0_i32_17 : i32 to vector<4x4xi32>
      %111 = arith.cmpi eq, %30, %110 : vector<4x4xi32>
      %112 = arith.andi %109, %111 : vector<4x4xi1>
      %113 = arith.extui %112 : vector<4x4xi1> to vector<4x4xi32>
      %114 = arith.sitofp %113 : vector<4x4xi32> to vector<4x4xf32>
      %cst = arith.constant 0.000000e+00 : f32
      %115 = vector.broadcast %cst : f32 to vector<1x1xf32>
      %116 = arith.subf %115, %26 : vector<1x1xf32>
      %117 = vector.broadcast %116 : vector<1x1xf32> to vector<4x4xf32>
      %118 = arith.mulf %114, %117 : vector<4x4xf32>
      %119 = arith.addf %107, %118 : vector<4x4xf32>
      %c2_i32_18 = arith.constant 2 : i32
      %120 = vector.broadcast %c2_i32_18 : i32 to vector<4x4xi32>
      %121 = arith.cmpi eq, %29, %120 : vector<4x4xi32>
      %c1_i32_19 = arith.constant 1 : i32
      %122 = vector.broadcast %c1_i32_19 : i32 to vector<4x4xi32>
      %123 = arith.cmpi eq, %30, %122 : vector<4x4xi32>
      %124 = arith.andi %121, %123 : vector<4x4xi1>
      %125 = arith.extui %124 : vector<4x4xi1> to vector<4x4xi32>
      %126 = arith.sitofp %125 : vector<4x4xi32> to vector<4x4xf32>
      %127 = arith.mulf %25, %24 : vector<1x1xf32>
      %128 = vector.broadcast %127 : vector<1x1xf32> to vector<4x4xf32>
      %129 = arith.mulf %126, %128 : vector<4x4xf32>
      %130 = arith.addf %119, %129 : vector<4x4xf32>
      %c2_i32_20 = arith.constant 2 : i32
      %131 = vector.broadcast %c2_i32_20 : i32 to vector<4x4xi32>
      %132 = arith.cmpi eq, %29, %131 : vector<4x4xi32>
      %c2_i32_21 = arith.constant 2 : i32
      %133 = vector.broadcast %c2_i32_21 : i32 to vector<4x4xi32>
      %134 = arith.cmpi eq, %30, %133 : vector<4x4xi32>
      %135 = arith.andi %132, %134 : vector<4x4xi1>
      %136 = arith.extui %135 : vector<4x4xi1> to vector<4x4xi32>
      %137 = arith.sitofp %136 : vector<4x4xi32> to vector<4x4xf32>
      %138 = arith.mulf %25, %23 : vector<1x1xf32>
      %139 = vector.broadcast %138 : vector<1x1xf32> to vector<4x4xf32>
      %140 = arith.mulf %137, %139 : vector<4x4xf32>
      %141 = arith.addf %130, %140 : vector<4x4xf32>
      %c3_i32 = arith.constant 3 : i32
      %142 = vector.broadcast %c3_i32 : i32 to vector<4x4xi32>
      %143 = arith.cmpi eq, %30, %142 : vector<4x4xi32>
      %c3_i32_22 = arith.constant 3 : i32
      %144 = vector.broadcast %c3_i32_22 : i32 to vector<4x4xi32>
      %145 = arith.cmpi slt, %29, %144 : vector<4x4xi32>
      %146 = arith.andi %143, %145 : vector<4x4xi1>
      %147 = arith.extui %146 : vector<4x4xi1> to vector<4x4xi32>
      %148 = arith.sitofp %147 : vector<4x4xi32> to vector<4x4xf32>
      %c0_23 = arith.constant 0 : index
      %c0_24 = arith.constant 0 : index
      %149 = vector.load %arg1[%c0_23, %c0_24] : memref<4x1xf32, #tpu.memory_space<vmem>>, vector<4x1xf32>
      %150 = vector.broadcast %149 : vector<4x1xf32> to vector<4x4xf32>
      %151 = arith.mulf %150, %148 : vector<4x4xf32>
      %152 = arith.addf %141, %151 : vector<4x4xf32>
      %c3_i32_25 = arith.constant 3 : i32
      %153 = vector.broadcast %c3_i32_25 : i32 to vector<4x4xi32>
      %154 = arith.cmpi eq, %29, %153 : vector<4x4xi32>
      %c3_i32_26 = arith.constant 3 : i32
      %155 = vector.broadcast %c3_i32_26 : i32 to vector<4x4xi32>
      %156 = arith.cmpi eq, %30, %155 : vector<4x4xi32>
      %157 = arith.andi %154, %156 : vector<4x4xi1>
      %158 = arith.extui %157 : vector<4x4xi1> to vector<4x4xi32>
      %159 = arith.sitofp %158 : vector<4x4xi32> to vector<4x4xf32>
      %160 = arith.addf %152, %159 : vector<4x4xf32>
      %c0_27 = arith.constant 0 : index
      %c0_28 = arith.constant 0 : index
      %161 = vector.load %arg3[%c0_27, %c0_28] : memref<4x4xf32, #tpu.memory_space<vmem>>, vector<4x4xf32>
      tpu.vector_store %arg3[%c0_27, %c0_28], %160 {strides = array<i32>} : memref<4x4xf32, #tpu.memory_space<vmem>>, vector<4x4xf32>,
    } else {
    }
    %3 = tpu.iota {dimensions = array<i32: 1>} : vector<1x128xi32>
    %c15_i32 = arith.constant 15 : i32
    %4 = vector.broadcast %c15_i32 : i32 to vector<1x128xi32>
    %5 = arith.andi %3, %4 : vector<1x128xi32>
    %c0_i32_1 = arith.constant 0 : i32
    %6 = vector.broadcast %c0_i32_1 : i32 to vector<1x128xi32>
    %7 = arith.cmpi eq, %5, %6 : vector<1x128xi32>
    %c5_i32 = arith.constant 5 : i32
    %8 = vector.broadcast %c5_i32 : i32 to vector<1x128xi32>
    %9 = arith.cmpi eq, %5, %8 : vector<1x128xi32>
    %10 = arith.ori %7, %9 : vector<1x128xi1>
    %c10_i32 = arith.constant 10 : i32
    %11 = vector.broadcast %c10_i32 : i32 to vector<1x128xi32>
    %12 = arith.cmpi eq, %5, %11 : vector<1x128xi32>
    %13 = arith.ori %10, %12 : vector<1x128xi1>
    %c15_i32_2 = arith.constant 15 : i32
    %14 = vector.broadcast %c15_i32_2 : i32 to vector<1x128xi32>
    %15 = arith.cmpi eq, %5, %14 : vector<1x128xi32>
    %16 = arith.ori %13, %15 : vector<1x128xi1>
    %17 = arith.extui %16 : vector<1x128xi1> to vector<1x128xi32>
    %18 = arith.sitofp %17 : vector<1x128xi32> to vector<1x128xf32>
    %c0 = arith.constant 0 : index
    %c0_3 = arith.constant 0 : index
    %19 = vector.load %arg4[%c0, %c0_3] : memref<1x128xf32, #tpu.memory_space<vmem>>, vector<1x128xf32>
    tpu.vector_store %arg4[%c0, %c0_3], %18 {strides = array<i32>} : memref<1x128xf32, #tpu.memory_space<vmem>>, vector<1x128xf32>,
    return
  }
  func.func @transform_0(%arg0: i32) -> (i32, i32) {
    %c0_i32 = arith.constant 0 : i32
    %c0_i32_0 = arith.constant 0 : i32
    %c0_i32_1 = arith.constant 0 : i32
    return %c0_i32, %c0_i32_0 : i32, i32
  }
  func.func @transform_1(%arg0: i32) -> (i32, i32) {
    %c0_i32 = arith.constant 0 : i32
    %c0_i32_0 = arith.constant 0 : i32
    %c0_i32_1 = arith.constant 0 : i32
    return %c0_i32, %c0_i32_0 : i32, i32
  }
  func.func @transform_2(%arg0: i32) -> (i32, i32) {
    %c0_i32 = arith.constant 0 : i32
    %c0_i32_0 = arith.constant 0 : i32
    %c0_i32_1 = arith.constant 0 : i32
    return %c0_i32, %c0_i32_0 : i32, i32
  }
  func.func @transform_3(%arg0: i32) -> (i32, i32) {
    %c0_i32 = arith.constant 0 : i32
    %c0_i32_0 = arith.constant 0 : i32
    return %arg0, %c0_i32 : i32, i32
  }
}

</mosaic_0001>

<bundles_post_ra>
// kernel: tpu_custom_call.1
= control target key start
LH: loop header
LB: loop body
LE: loop exit
PB: predicated region body
PF: predicated region fallthrough
CT: control target
= control target key end

     0   :  { %9 = vsyncpa [#allocation3], 0  ;;  %s681_s0 = inlined_call_operand.vmem [shape: f32[4,1], index: 0, kind: input, shape index: {}]   ;;  %s682_s1 = inlined_call_operand.vmem [shape: f32[1,3], index: 1, kind: input, shape index: {}]   ;;  %s683_s2 = inlined_call_operand.hbm [shape: f32[4,4], index: 2, kind: output, shape index: {0}]   ;;  %s684_s3 = inlined_call_operand.hbm [shape: f32[1,128], index: 3, kind: output, shape index: {1}]  }
   0x1   :  { %v582_v0 = vld [vmem:[%s682_s1] sm:$0x1] }
   0x2   :  { %v23_v1 = vand.u32 2139095040, %v582_v0  ;;  %v20_v3 = vand.u32 2147483647, %v582_v0 }
   0x4   :  { %v24_v2 = vshrl.u32 %v23_v1, 23 }
   0x5   :  { %10 = vsyncpa [#allocation5], 0  ;;  %v27_v6 = vand.u32 8388607, %v20_v3  ;;  %v545_v12 = vmov 683565275   ;;  %vm112_vm15 = vweird.f32 %v582_v0 }
   0x6   :  { %v449_v4 = vadd.s32 4294967169, %v24_v2  ;;  %v546_v14 = vmov 2475754826   ;;  %v547_v16 = vmov 2131351028   ;;  %vm22_vm7 = vcmp.lt.s32.totalorder %v582_v0, 0 }
   0x7   :  { %v28_v9 = vor.u32 8388608, %v27_v6  ;;  %v548_v18 = vmov 2102212464   ;;  %v549_v20 = vmov 920167782   ;;  %s552_s1 = smov 1  }
   0x8   :  { %v30_v5 = vadd.s32 1, %v449_v4  ;;  %v550_v27 = vmov 1326507024   ;;  %vm21_vm8 = vcmp.le.f32.partialorder %v20_v3, 0.7853982  ;;  %v551_v3 = vmov 2  }
   0x9   :  { %v68_v29 = vshll.u32 %v28_v9, 8  ;;  %487 = vset.pattern.permute.xlu0 %v551_v3  ;;  %488 = vset.pattern.permute.xlu1 %v551_v3  ;;  %s553_s14 = smov 2   ;;  %s556_s17 = smov [#allocation4]  }
   0xa   :  { %vm31_vm0 = vcmp.gt.s32.totalorder %v30_v5, 0  ;;  %s437_s18 = sshll.u32 %s556_s17, 4  ;;  %s438_s18 = int_to_ptr.vmem [resolvable:$true] %s437_s18 }
   0xb   :  { %v32_v7 = vsel %vm31_vm0, %v30_v5, 0  ;;  %s501_s19 = scalar_lea.vmem %s438_s18, 32  ;;  %p502_p1 = scmp.lt.s32.totalorder %s438_s18, %s438_s18 }
   0xc   :  { %v34_v8 = vand.u32 31, %v32_v7  ;;  %v33_v10 = vshrl.u32 %v32_v7, 5 }
   0xe   :  { %v35_v11 = vsub.s32 32, %v34_v8  ;;  %v37_v13 = vshll.u32 %v545_v12, %v34_v8  ;;  %v40_v15 = vshll.u32 %v546_v14, %v34_v8  ;;  %v43_v17 = vshll.u32 %v547_v16, %v34_v8 }
   0xf   :  { %v46_v19 = vshll.u32 %v548_v18, %v34_v8  ;;  %v49_v21 = vshll.u32 %v549_v20, %v34_v8  ;;  %vm52_vm1 = vcmp.lt.s32.totalorder %v33_v10, 1  ;;  %vm55_vm2 = vcmp.lt.s32.totalorder %v33_v10, 4 }
  0x10   :  { %v36_v22 = vshrl.u32 %v545_v12, %v35_v11  ;;  %v38_v23 = vshrl.u32 %v546_v14, %v35_v11  ;;  %v41_v24 = vshrl.u32 %v547_v16, %v35_v11  ;;  %v44_v25 = vshrl.u32 %v548_v18, %v35_v11 }
  0x11   :  { %v47_v26 = vshrl.u32 %v549_v20, %v35_v11  ;;  %v50_v28 = vshrl.u32 %v550_v27, %v35_v11  ;;  %vm53_vm3 = vcmp.lt.s32.totalorder %v33_v10, 2  ;;  %vm54_vm4 = vcmp.lt.s32.totalorder %v33_v10, 3 }
  0x12   :  { %v39_v30 = vor.u32 %v38_v23, %v37_v13  ;;  %v42_v31 = vor.u32 %v41_v24, %v40_v15  ;;  %v45_v32 = vor.u32 %v44_v25, %v43_v17 }
  0x13   :  { %v48_v33 = vor.u32 %v47_v26, %v46_v19  ;;  %v51_v34 = vor.u32 %v50_v28, %v49_v21 }
  0x14   :  { %v56_v35 = vsel %vm52_vm1, %v36_v22, %v39_v30  ;;  %v57_v36 = vsel %vm55_vm2, %v45_v32, 2102212464  ;;  %v60_v37 = vsel %vm52_vm1, %v39_v30, %v42_v31  ;;  %v64_v38 = vsel %vm52_vm1, %v42_v31, %v45_v32 }
  0x15   :  { %v58_v39 = vsel %vm54_vm4, %v42_v31, %v57_v36  ;;  %v61_v40 = vsel %vm55_vm2, %v48_v33, 920167782  ;;  %v65_v41 = vsel %vm55_vm2, %v51_v34, 1326507024 }
  0x16   :  { %v62_v42 = vsel %vm54_vm4, %v45_v32, %v61_v40  ;;  %v66_v43 = vsel %vm54_vm4, %v48_v33, %v65_v41  ;;  %v59_v44 = vsel %vm53_vm3, %v56_v35, %v58_v39  ;;  %v227_v35 = vlaneseq }
  0x17   :  { %v63_v45 = vsel %vm53_vm3, %v60_v37, %v62_v42  ;;  %v67_v46 = vsel %vm53_vm3, %v64_v38, %v66_v43  ;;  %v75_v51 = vmul.u32 %v68_v29, %v59_v44 }
  0x18   :  { %v588_v47 = vmul.u32.u64.low %v68_v29, %v67_v46  ;;  %v589_v48 = vmul.u32.u64.high %v68_v29, %v67_v46, %v588_v47  ;;  %v591_v49 = vmul.u32.u64.low %v68_v29, %v63_v45  ;;  %v592_v50 = vmul.u32.u64.high %v68_v29, %v63_v45, %v591_v49 }
  0x19   :  { %v603_v38 = vshrl.u32 %v227_v35, 7 }
  0x1a   :  { %vm77_vm5 = vc.u32 %v589_v48, %v591_v49  ;;  %v78_v52 = vadd.s32 1, %v592_v50  ;;  %v76_v63 = vadd.s32 %v591_v49, %v589_v48 }
  0x1b   :  { %v244_v45 = vsub.s32 0, %v603_v38 }
  0x1c   :  { %v79_v53 = vsel %vm77_vm5, %v78_v52, %v592_v50 }
  0x1d   :  { %v80_v54 = vadd.s32 %v79_v53, %v75_v51 }
  0x1f   :  { %v81_v55 = vadd.s32 536870912, %v80_v54 }
  0x21   :  { %v82_v56 = vshrl.u32 %v81_v55, 30 }
  0x23   :  { %v83_v57 = vshll.u32 %v82_v56, 30  ;;  %v106_v13 = vsub.s32 4, %v82_v56 }
  0x25   :  { %v84_v58 = vsub.s32 %v80_v54, %v83_v57  ;;  %v107_v16 = vsel %vm22_vm7, %v106_v13, %v82_v56 }
  0x26   :  { %v109_v19 = vsel %vm21_vm8, 0, %v107_v16 }
  0x27   :  { %v86_v59 = vsub.s32 0, %v84_v58  ;;  %v216_v20 = vadd.s32 3, %v109_v19  ;;  %v113_v22 = vand.u32 3, %v109_v19 }
  0x29   :  { %v450_v60 = vmin.u32 %v86_v59, %v84_v58  ;;  %v217_v21 = vand.u32 3, %v216_v20  ;;  %vm118_vm10 = vcmp.eq.s32.totalorder %v113_v22, 2  ;;  %vm115_vm12 = vcmp.eq.s32.totalorder %v113_v22, 0 }
  0x2a   :  { %vm114_vm14 = vcmp.lt.s32.totalorder %v113_v22, 2 }
  0x2b   :  { %v88_v61 = vclz %v450_v60  ;;  %vm222_vm9 = vcmp.eq.s32.totalorder %v217_v21, 2  ;;  %vm219_vm11 = vcmp.eq.s32.totalorder %v217_v21, 0  ;;  %vm218_vm13 = vcmp.lt.s32.totalorder %v217_v21, 2 }
  0x2d   :  { %v451_v62 = vadd.s32 4294967294, %v88_v61 }
  0x2f   :  { %vm452_vm6 = vcmp.lt.s32.totalorder %v451_v62, 0 }
  0x30   :  { %v91_v1 = vsel %vm452_vm6, 0, %v451_v62 }
  0x31   :  { %v92_v2 = vsub.s32 32, %v91_v1  ;;  %v93_v4 = vshll.u32 %v84_v58, %v91_v1  ;;  %v96_v5 = vsub.s32 4294967266, %v91_v1 }
  0x33   :  { %v94_v6 = vshrl.u32 %v76_v63, %v92_v2  ;;  %v97_v7 = vadd.s32 127, %v96_v5  ;;  %v555_v5 = vmov 0  }
  0x35   :  { %v95_v8 = vor.u32 %v94_v6, %v93_v4  ;;  %v98_v9 = vshll.u32 %v97_v7, 23  ;;  %v554_v4 = vmov 1   ;;  %v393_v6 = vld [vmem:[%s681_s0] sm:$0xf]  ;;  %v609_v7 = vand.u32 127, %v227_v35  ;;  %s497_s0 = scalar_lea.vmem %s438_s18, 16 }
  0x36   :  { %p498_p0 = scmp.ne.s32.totalorder %s438_s18, %s497_s0  ;;  %p503_p2 = scmp.lt.s32.totalorder %s501_s19, %s497_s0 }
  0x37   :  { %v99_v10 = vor.u32 4788187, %v98_v9  ;;  %v102_v11 = vcvt.s32.f32 %v95_v8  ;;  %v410_v8 = vand.u32 15, %v609_v7  ;;  %v557_v9 = vmov 0.0  }
  0x38   :  { %p504_p3 = por %p503_p2, %p502_p1 }
  0x39   :  { %v100_v12 = vand.u32 2147483647, %v99_v10  ;;  %vm411_vm0 = vcmp.eq.s32.totalorder %v410_v8, 0  ;;  %vm412_vm1 = vcmp.eq.s32.totalorder %v410_v8, 5  ;;  %vm414_vm2 = vcmp.eq.s32.totalorder %v410_v8, 10 }
  0x3a   :  { %vm413_vm3 = vmor %vm411_vm0, %vm412_vm1  ;;  %vm416_vm4 = vcmp.eq.s32.totalorder %v410_v8, 15  ;;  %p505_p4 = pnand %p504_p3, %p498_p0 }
  0x3b   :  { %v103_v14 = vmul.f32 %v102_v11, %v100_v12  ;;  %vm415_vm5 = vmor %vm413_vm3, %vm414_vm2 }
  0x3c   :  { %vm417_vm6 = vmor %vm415_vm5, %vm416_vm4 }
  0x3d   :  { %v104_v15 = vxor.u32 2147483648, %v103_v14  ;;  %v468_v10 = vsel %vm417_vm6, 1.0, %v557_v9 }
  0x3e   :  { %420 = vst [vmem:[#allocation4] sm:$0x1] %v468_v10 }
  0x3f   :  { %v105_v17 = vsel %vm22_vm7, %v104_v15, %v103_v14 }
  0x40   :  { %v108_v18 = vsel %vm21_vm8, %v582_v0, %v105_v17 }
  0x41   :  { %493 = vcosq.f32 %v108_v18 }
  0x42   :  { %495 = vsinq.f32 %v108_v18 }
  0x4b   :  { %v494_v23 = vpop.eup %493 }
  0x4c   :  { %v496_v24 = vpop.eup %495  ;;  %v119_v25 = vxor.u32 2147483648, %v494_v23 }
  0x4d   :  { %v116_v26 = vxor.u32 2147483648, %v496_v24 }
  0x4e   :  { %v224_v27 = vsel %vm222_vm9, %v119_v25, %v496_v24  ;;  %v120_v28 = vsel %vm118_vm10, %v119_v25, %v496_v24 }
  0x4f   :  { %v221_v29 = vsel %vm219_vm11, %v494_v23, %v116_v26  ;;  %v117_v30 = vsel %vm115_vm12, %v494_v23, %v116_v26 }
  0x50   :  { %v225_v31 = vsel %vm218_vm13, %v221_v29, %v224_v27  ;;  %v121_v32 = vsel %vm114_vm14, %v117_v30, %v120_v28 }
  0x51   :  { %v226_v33 = vsel %vm112_vm15, nan, %v225_v31  ;;  %v122_v34 = vsel %vm112_vm15, nan, %v121_v32 }
  0x52   :  { %256 = vrot.lane.b32.xlu0 %v226_v33, %s552_s1  ;;  %264 = vrot.lane.b32.xlu1 %v122_v34, %s553_s14  ;;  %v353_v62 = vsub.f32 0.0, %v226_v33 }
  0x54   :  { %v358_v1 = vrot.slane %v353_v62, %v244_v45 }
  0x56   :  { %260 = vrot.lane.b32.xlu0 %v226_v33, %s553_s14  ;;  %237 = vrot.lane.b32.xlu1 %v122_v34, %s552_s1 }
  0xc4   :  { %v257_v36 = vpop.permute.xlu0 %256  ;;  %v265_v37 = vpop.permute.xlu1 %264 }
  0xc5   :  { %v259_v0 = vmul.f32 %v257_v36, %v122_v34  ;;  %v267_v39 = vmul.f32 %v265_v37, %v226_v33  ;;  %v317_v44 = vmul.f32 %v257_v36, %v226_v33  ;;  %v319_v52 = vmul.f32 %v265_v37, %v122_v34 }
  0xc7   :  { %v284_v48 = vmul.f32 %v265_v37, %v259_v0  ;;  %v335_v56 = vmul.f32 %v317_v44, %v265_v37  ;;  %v372_v2 = vrot.slane %v259_v0, %v244_v45 }
  0xc8   :  { %v261_v40 = vpop.permute.xlu0 %260  ;;  %v238_v41 = vpop.permute.xlu1 %237 }
  0xc9   :  { %v263_v42 = vmul.f32 %v261_v40, %v259_v0  ;;  %v285_v43 = vmul.f32 %v261_v40, %v226_v33  ;;  %v240_v46 = vmul.f32 %v238_v41, %v122_v34  ;;  %v302_v47 = vmul.f32 %v238_v41, %v226_v33 }
  0xca   :  { %v336_v50 = vmul.f32 %v261_v40, %v122_v34  ;;  %v318_v53 = vmul.f32 %v317_v44, %v261_v40 }
  0xcb   :  { %v268_v49 = vsub.f32 %v263_v42, %v267_v39  ;;  %v245_v51 = vrot.slane %v240_v46, %v244_v45  ;;  %v286_v55 = vadd.f32 %v285_v43, %v284_v48  ;;  %v307_v57 = vrot.slane %v302_v47, %v244_v45 }
  0xcc   :  { %v337_v58 = vsub.f32 %v335_v56, %v336_v50  ;;  %v320_v60 = vadd.f32 %v319_v52, %v318_v53 }
  0xcd   :  { %v273_v54 = vrot.slane %v268_v49, %v244_v45  ;;  %247 = vperm.xlu0 %487, %v245_v51   ;;  %v291_v59 = vrot.slane %v286_v55, %v244_v45 }
  0xce   :  { %v342_v61 = vrot.slane %v337_v58, %v244_v45  ;;  %v325_v63 = vrot.slane %v320_v60, %v244_v45 }
  0xcf   :  { %275 = vperm.xlu1 %488, %v273_v54  }
  0xd1   :  { %309 = vperm.xlu0 %487, %v307_v57  }
  0xd3   :  { %293 = vperm.xlu1 %488, %v291_v59  }
  0xd5   :  { %344 = vperm.xlu0 %487, %v342_v61  }
  0xd7   :  { %327 = vperm.xlu1 %488, %v325_v63  }
  0xd9   :  { %490 = vset.pattern.permute.xlu0 %v554_v4 }
  0xda   :  { %374 = vperm.xlu0 %490, %v372_v2  }
  0xdb   :  { %489 = vset.pattern.permute.xlu1 %v554_v4 }
  0xdc   :  { %360 = vperm.xlu1 %489, %v358_v1  }
  0xde   :  { %492 = vset.pattern.permute.xlu0 %v555_v5 }
  0xe0   :  { %383 = vperm.xlu1 %489, %v245_v51  }
  0xe4   :  { %491 = vset.pattern.permute.xlu1 %v555_v5 }
  0xe5   :  { %396 = vperm.xlu1 %491, %v393_v6  }
  0xe6   :  { %508 = shalt.err (!%p505_p4)
}
  0xe7   :  { %s509_s22 = scalar_lea.hbm %s684_s3, 16 }
  0xe8   :  { %p510_p5 = scmp.ne.s32.totalorder %s684_s3, %s509_s22  ;;  %p513_p6 = scmp.lt.u32.totalorder %s509_s22, %s684_s3 }
  0xea   :  { %p515_p7 = pnand %p513_p6, %p510_p5 }
  0xec   :  { %518 = shalt.err (!%p515_p7)
}
  0xed   :  { %440 = dma.vmem_to_hbm [thread:$0]  %s438_s18, 16, %s684_s3, [#allocation5]   ;;  %vm231_vm7 = vcmp.eq.s32.totalorder %v603_v38, 0  ;;  %vm232_vm8 = vcmp.eq.s32.totalorder %v609_v7, 0  ;;  %vm251_vm9 = vcmp.eq.s32.totalorder %v609_v7, 1  ;;  %vm298_vm12 = vcmp.eq.s32.totalorder %v603_v38, 1 }
  0xee   :  { %vm233_vm10 = vmand %vm231_vm7, %vm232_vm8  ;;  %vm280_vm13 = vcmp.eq.s32.totalorder %v609_v7, 2  ;;  %vm349_vm2 = vcmp.eq.s32.totalorder %v603_v38, 2  ;;  %vm388_vm6 = vcmp.eq.s32.totalorder %v609_v7, 3  ;;  %s558_s3 = smov [#allocation2]  }
  0xef   :  { %vm252_vm11 = vmand %vm231_vm7, %vm251_vm9  ;;  %v457_v11 = vsel %vm233_vm10, 1.0, %v557_v9  ;;  %s427_s29 = sshll.u32 %s558_s3, 4  ;;  %s428_s29 = int_to_ptr.vmem [resolvable:$true] %s427_s29 }
  0xf0   :  { %v458_v12 = vsel %vm252_vm11, 1.0, %v557_v9  ;;  %vm299_vm14 = vmand %vm298_vm12, %vm232_vm8  ;;  %vm406_vm11 = vcmask 27648   ;;  %s519_s30 = scalar_lea.vmem %s428_s29, 64  ;;  %p524_p9 = scmp.lt.s32.totalorder %s428_s29, %s428_s29 }
  0xf1   :  { %vm281_vm15 = vmand %vm231_vm7, %vm280_vm13  ;;  %v460_v17 = vsel %vm299_vm14, 1.0, %v557_v9  ;;  %vm389_vm7 = vcmp.lt.s32.totalorder %v603_v38, 3  ;;  %p520_p8 = scmp.ne.s32.totalorder %s428_s29, %s519_s30  ;;  %p525_p10 = scmp.lt.s32.totalorder %s519_s30, %s519_s30 }
  0xf2   :  { %v459_v18 = vsel %vm281_vm15, 1.0, %v557_v9  ;;  %vm314_vm0 = vmand %vm298_vm12, %vm251_vm9 }
  0xf3   :  { %vm332_vm1 = vmand %vm298_vm12, %vm280_vm13  ;;  %v461_v24 = vsel %vm314_vm0, 1.0, %v557_v9  ;;  %p526_p11 = por %p525_p10, %p524_p9 }
  0xf4   :  { %v462_v26 = vsel %vm332_vm1, 1.0, %v557_v9  ;;  %vm350_vm3 = vmand %vm349_vm2, %vm232_vm8 }
  0xf5   :  { %vm365_vm4 = vmand %vm349_vm2, %vm251_vm9  ;;  %v463_v32 = vsel %vm350_vm3, 1.0, %v557_v9  ;;  %vm401_vm9 = vcmp.eq.s32.totalorder %v603_v38, 3  ;;  %p527_p12 = pnand %p526_p11, %p520_p8 }
  0xf6   :  { %vm379_vm5 = vmand %vm349_vm2, %vm280_vm13  ;;  %v464_v35 = vsel %vm365_vm4, 1.0, %v557_v9 }
  0xf7   :  { %v465_v39 = vsel %vm379_vm5, 1.0, %v557_v9  ;;  %vm390_vm8 = vmand %vm388_vm6, %vm389_vm7 }
  0xf8   :  { %v466_v44 = vsel %vm390_vm8, 1.0, %v557_v9  ;;  %vm402_vm10 = vmand %vm401_vm9, %vm388_vm6 }
  0xf9   :  { %v467_v48 = vsel %vm402_vm10, 1.0, %v557_v9 }
 0x14c   :  { %v248_v13 = vpop.permute.xlu0 %247 }
 0x14d   :  { %v250_v15 = vmul.f32 %v457_v11, %v248_v13 }
 0x14e   :  { %v276_v14 = vpop.permute.xlu1 %275 }
 0x14f   :  { %v278_v16 = vmul.f32 %v458_v12, %v276_v14 }
 0x150   :  { %v310_v19 = vpop.permute.xlu0 %309 }
 0x151   :  { %v279_v21 = vadd.f32 %v278_v16, %v250_v15  ;;  %v312_v22 = vmul.f32 %v460_v17, %v310_v19 }
 0x152   :  { %v294_v20 = vpop.permute.xlu1 %293 }
 0x153   :  { %v296_v23 = vmul.f32 %v459_v18, %v294_v20 }
 0x154   :  { %v345_v3 = vpop.permute.xlu0 %344 }
 0x155   :  { %v297_v25 = vadd.f32 %v296_v23, %v279_v21  ;;  %v347_v30 = vmul.f32 %v462_v26, %v345_v3 }
 0x156   :  { %v328_v27 = vpop.permute.xlu1 %327 }
 0x157   :  { %v313_v28 = vadd.f32 %v312_v22, %v297_v25  ;;  %v330_v29 = vmul.f32 %v461_v24, %v328_v27 }
 0x159   :  { %v331_v31 = vadd.f32 %v330_v29, %v313_v28  ;;  %v375_v36 = vpop.permute.xlu0 %374 }
 0x15a   :  { %v377_v40 = vmul.f32 %v464_v35, %v375_v36 }
 0x15b   :  { %v348_v33 = vadd.f32 %v347_v30, %v331_v31  ;;  %v361_v34 = vpop.permute.xlu1 %360 }
 0x15c   :  { %v363_v37 = vmul.f32 %v463_v32, %v361_v34 }
 0x15e   :  { %v364_v0 = vadd.f32 %v363_v37, %v348_v33 }
 0x15f   :  { %v384_v41 = vpop.permute.xlu1 %383 }
 0x160   :  { %v378_v42 = vadd.f32 %v377_v40, %v364_v0  ;;  %v386_v43 = vmul.f32 %v465_v39, %v384_v41 }
 0x162   :  { %v387_v46 = vadd.f32 %v386_v43, %v378_v42 }
 0x164   :  { %v397_v45 = vpop.permute.xlu1 %396 }
 0x165   :  { %v399_v47 = vmul.f32 %v466_v44, %v397_v45 }
 0x167   :  { %v400_v49 = vadd.f32 %v399_v47, %v387_v46 }
 0x169   :  { %v405_v50 = vadd.f32 %v467_v48, %v400_v49 }
 0x16b   :  { %407 = vst.msk [vmem:[#allocation2] sm:$0xf] %vm406_vm11, %v405_v50 }
 0x16c   :  { %530 = shalt.err (!%p527_p12)
}
 0x16d   :  { %s531_s6 = scalar_lea.hbm %s683_s2, 64 }
 0x16e   :  { %p532_p13 = scmp.ne.s32.totalorder %s683_s2, %s531_s6  ;;  %p535_p0 = scmp.lt.u32.totalorder %s531_s6, %s683_s2 }
 0x170   :  { %p537_p1 = pnand %p535_p0, %p532_p13 }
 0x172   :  { %540 = shalt.err (!%p537_p1)
}
 0x173   :  { %430 = dma.vmem_to_hbm [thread:$0]  %s428_s29, 64, %s683_s2, [#allocation3]  }
 0x174   :  { %541 = dma.done.wait [#allocation3], 64  }
 0x175   :  { %542 = vsyncadd [#allocation3], 4294967232 }
 0x176   :  { %543 = dma.done.wait [#allocation5], 16  }
 0x177   :  { %544 = vsyncadd [#allocation5], 4294967280 }
 0x178   :  { %447 = vsyncpa [#allocation3], 1 }
 0x179   :  { %448 = vsyncpa [#allocation5], 1 }

</bundles_post_ra>
